<compile_context>
chip_gen: v5e
topology: v5e:2x2
jax: 0.10.0
libtpu: 0.0.40
codegen_flags: <defaults>
</compile_context>

<pallas_src>
import functools

import jax
import jax.numpy as jnp
from jax.experimental import pallas as pl
from jax.experimental.pallas import tpu as pltpu


def _lem_seq_kernel(x_ref,                       # (1, TB, ninp)   current time step
                    wi_ref, bi_ref,              # (4, ninp, nhid), (4, 1, nhid)
                    wh_ref, bh_ref,              # (3, nhid, nhid), (3, 1, nhid)
                    wz_ref, bz_ref,              # (nhid, nhid),    (1, nhid)
                    wc_ref, bc_ref,              # (nhid, nout),    (1, nout)
                    out_ref,                     # (TB, nout)
                    y_sc, z_sc,                  # (TB, nhid) f32 VMEM carries
                    *, dt):
    t = pl.program_id(1)

    # Fresh y/z carry at the start of every sequence (per batch tile).
    @pl.when(t == 0)
    def _init():
        y_sc[...] = jnp.zeros_like(y_sc)
        z_sc[...] = jnp.zeros_like(z_sc)

    x = x_ref[0]                 # (TB, ninp), input dtype
    y = y_sc[...]                # f32
    z = z_sc[...]                # f32

    cdt = wi_ref.dtype           # matmul (MXU) input dtype: f32 or bf16
    xc = x.astype(cdt)
    yc = y.astype(cdt)

    # inp2hid: four aligned (ninp, nhid) matmuls instead of one lane-sliced 4*nhid one.
    i_dt1 = jnp.dot(xc, wi_ref[0], preferred_element_type=jnp.float32) + bi_ref[0]
    i_dt2 = jnp.dot(xc, wi_ref[1], preferred_element_type=jnp.float32) + bi_ref[1]
    i_z   = jnp.dot(xc, wi_ref[2], preferred_element_type=jnp.float32) + bi_ref[2]
    i_y   = jnp.dot(xc, wi_ref[3], preferred_element_type=jnp.float32) + bi_ref[3]

    # hid2hid: three aligned (nhid, nhid) matmuls.
    h_dt1 = jnp.dot(yc, wh_ref[0], preferred_element_type=jnp.float32) + bh_ref[0]
    h_dt2 = jnp.dot(yc, wh_ref[1], preferred_element_type=jnp.float32) + bh_ref[1]
    h_y   = jnp.dot(yc, wh_ref[2], preferred_element_type=jnp.float32) + bh_ref[2]

    # Element-wise / transcendental math in f32 (VPU/EUP safe on v5e too).
    ms_dt_bar = dt * jax.nn.sigmoid(i_dt1 + h_dt1)
    ms_dt     = dt * jax.nn.sigmoid(i_dt2 + h_dt2)

    z_new = (1.0 - ms_dt) * z + ms_dt * jnp.tanh(i_y + h_y)

    tz = jnp.dot(z_new.astype(cdt), wz_ref[...],
                 preferred_element_type=jnp.float32) + bz_ref[...]
    y_new = (1.0 - ms_dt_bar) * y + ms_dt_bar * jnp.tanh(tz + i_z)

    y_sc[...] = y_new
    z_sc[...] = z_new

    # Classifier on the final hidden state; output block is written once per batch tile.
    @pl.when(t == pl.num_programs(1) - 1)
    def _finalize():
        out = jnp.dot(y_new.astype(cdt), wc_ref[...],
                      preferred_element_type=jnp.float32) + bc_ref[...]
        out_ref[...] = out.astype(out_ref.dtype)


def lem_forward(inp, params, dt, *, batch_tile=None, param_dtype=jnp.float32):
    """Full LEM forward: inp (T, B, ninp) -> classifier output (B, nout)."""
    T, B, ninp = inp.shape
    nhid = params["wz"].shape[0]
    nout = params["wc"].shape[0]

    # ---- restructure weights: aligned (in, out) slabs per chunk, optional bf16 ----
    wi4 = params["wi"].reshape(4, nhid, ninp).transpose(0, 2, 1).astype(param_dtype)  # (4, ninp, nhid)
    bi4 = params["bi"].reshape(4, 1, nhid).astype(jnp.float32)                        # (4, 1, nhid)
    wh3 = params["wh"].reshape(3, nhid, nhid).transpose(0, 2, 1).astype(param_dtype)  # (3, nhid, nhid)
    bh3 = params["bh"].reshape(3, 1, nhid).astype(jnp.float32)                        # (3, 1, nhid)
    wz_t = params["wz"].T.astype(param_dtype)                                         # (nhid, nhid)
    bz = params["bz"][None, :].astype(jnp.float32)                                    # (1, nhid)
    wc_t = params["wc"].T.astype(param_dtype)                                         # (nhid, nout)
    bc = params["bc"][None, :].astype(jnp.float32)                                    # (1, nout)

    # ---- batch tile choice: multiple of 8 (f32 sublane), 256-512 preferred ----
    if batch_tile is None:
        if B <= 512:
            batch_tile = B
        else:
            batch_tile = next((tb for tb in (512, 384, 256, 128, 64, 32, 16, 8)
                               if B % tb == 0), B)
    if B % batch_tile != 0 or (batch_tile != B and batch_tile % 8 != 0):
        batch_tile = B
    nb = B // batch_tile

    kernel = functools.partial(_lem_seq_kernel, dt=float(dt))

    p_item = jnp.dtype(param_dtype).itemsize
    in_item = jnp.dtype(inp.dtype).itemsize
    weight_bytes = (4 * ninp * nhid + 3 * nhid * nhid + nhid * nhid + nhid * nout) * p_item
    bias_bytes = (4 * nhid + 3 * nhid + nhid + nout) * 4
    act_block_bytes = batch_tile * ninp * in_item + batch_tile * nout * in_item
    scratch_bytes = 2 * batch_tile * nhid * 4
    # double-buffer budget for everything + margin; keep under v7x's 64 MiB physical VMEM.
    need = 2 * (weight_bytes + bias_bytes) + 2 * act_block_bytes + scratch_bytes + (4 << 20)
    vmem_limit = int(min(56 << 20, max(need, 32 << 20)))

    cost = pl.CostEstimate(
        flops=2 * T * B * (4 * ninp * nhid + 3 * nhid * nhid + nhid * nhid)
              + 2 * B * nhid * nout,
        transcendentals=4 * T * B * nhid,
        bytes_accessed=inp.size * in_item + B * nout * in_item + weight_bytes + bias_bytes,
    )

    # Weights / biases: constant block index -> fetched once, VMEM-resident.
    const3 = lambda shape: pl.BlockSpec(shape, lambda b, t: (0, 0, 0))
    const2 = lambda shape: pl.BlockSpec(shape, lambda b, t: (0, 0))

    out = pl.pallas_call(
        kernel,
        grid=(nb, T),
        in_specs=[
            pl.BlockSpec((1, batch_tile, ninp), lambda b, t: (t, b, 0)),   # x_t tile
            const3(wi4.shape), const3(bi4.shape),
            const3(wh3.shape), const3(bh3.shape),
            const2(wz_t.shape), const2(bz.shape),
            const2(wc_t.shape), const2(bc.shape),
        ],
        out_specs=pl.BlockSpec((batch_tile, nout), lambda b, t: (b, 0)),
        out_shape=jax.ShapeDtypeStruct((B, nout), inp.dtype),
        scratch_shapes=[
            pltpu.VMEM((batch_tile, nhid), jnp.float32),   # y carry
            pltpu.VMEM((batch_tile, nhid), jnp.float32),   # z carry
        ],
        compiler_params=pltpu.CompilerParams(
            dimension_semantics=("parallel", "arbitrary"),
            vmem_limit_bytes=vmem_limit,
        ),
        cost_estimate=cost,
    )(inp, wi4, bi4, wh3, bh3, wz_t, bz, wc_t, bc)
    return out


def lem_ref(inp, params, dt):
    """Pure-JAX reference mirroring the PyTorch LEM forward."""
    T, B, _ = inp.shape
    nhid = params["wz"].shape[0]
    y = jnp.zeros((B, nhid), jnp.float32)
    z = jnp.zeros((B, nhid), jnp.float32)
    for t in range(T):
        x = inp[t]
        ti = x @ params["wi"].T + params["bi"]
        th = y @ params["wh"].T + params["bh"]
        i_dt1, i_dt2, i_z, i_y = jnp.split(ti, 4, axis=1)
        h_dt1, h_dt2, h_y = jnp.split(th, 3, axis=1)
        ms_dt_bar = dt * jax.nn.sigmoid(i_dt1 + h_dt1)
        ms_dt = dt * jax.nn.sigmoid(i_dt2 + h_dt2)
        z = (1.0 - ms_dt) * z + ms_dt * jnp.tanh(i_y + h_y)
        y = (1.0 - ms_dt_bar) * y + ms_dt_bar * jnp.tanh(
            z @ params["wz"].T + params["bz"] + i_z)
    return y @ params["wc"].T + params["bc"]


def init_params(key, ninp, nhid, nout):
    """LEMCell: uniform(-1/sqrt(nhid), 1/sqrt(nhid)); classifier weight ~ kaiming-normal."""
    std = 1.0 / jnp.sqrt(jnp.float32(nhid))
    keys = jax.random.split(key, 8)
    u = lambda k, shape: jax.random.uniform(k, shape, jnp.float32, -std, std)
    return {
        "wi": u(keys[0], (4 * nhid, ninp)),
        "bi": u(keys[1], (4 * nhid,)),
        "wh": u(keys[2], (3 * nhid, nhid)),
        "bh": u(keys[3], (3 * nhid,)),
        "wz": u(keys[4], (nhid, nhid)),
        "bz": u(keys[5], (nhid,)),
        "wc": jax.random.normal(keys[6], (nout, nhid), jnp.float32)
              * jnp.sqrt(jnp.float32(2.0 / nhid)),
        "bc": u(keys[7], (nout,)),
    }


if __name__ == "__main__":
    T, B, ninp, nhid, nout = 8, 8, 16, 32, 4
    dt = 0.5

    key = jax.random.PRNGKey(0)
    k_inp, k_p = jax.random.split(key)
    inp = jax.random.normal(k_inp, (T, B, ninp), jnp.float32)
    params = init_params(k_p, ninp, nhid, nout)

    ref = lem_ref(inp, params, dt)

    # f32 weight path: tight check.
    out_f32 = lem_forward(inp, params, dt, param_dtype=jnp.float32)
    jax.block_until_ready(out_f32)
    assert out_f32.shape == (B, nout)
    assert jnp.allclose(out_f32, ref, atol=1e-4, rtol=1e-4), \
        float(jnp.max(jnp.abs(out_f32 - ref)))

    # bf16 weight path (halved HBM/VMEM traffic, 2x MXU rate): loose check.
    out_bf16 = lem_forward(inp, params, dt, param_dtype=jnp.bfloat16)
    jax.block_until_ready(out_bf16)
    assert jnp.allclose(out_bf16, ref, atol=1e-1, rtol=1e-1), \
        float(jnp.max(jnp.abs(out_bf16 - ref)))

    print("KERNEL_OK")
</pallas_src>

<mosaic_0001>
module attributes {stable_mosaic.version = 11 : i64} {
  func.func @_lem_seq_kernel(%arg0: i32, %arg1: i32, %arg2: memref<1x8x16xf32, #tpu.memory_space<vmem>>, %arg3: memref<4x16x32xf32, #tpu.memory_space<vmem>>, %arg4: memref<4x1x32xf32, #tpu.memory_space<vmem>>, %arg5: memref<3x32x32xf32, #tpu.memory_space<vmem>>, %arg6: memref<3x1x32xf32, #tpu.memory_space<vmem>>, %arg7: memref<32x32xf32, #tpu.memory_space<vmem>>, %arg8: memref<1x32xf32, #tpu.memory_space<vmem>>, %arg9: memref<32x4xf32, #tpu.memory_space<vmem>>, %arg10: memref<1x4xf32, #tpu.memory_space<vmem>>, %arg11: memref<8x4xf32, #tpu.memory_space<vmem>>, %arg12: memref<8x32xf32, #tpu.memory_space<vmem>>, %arg13: memref<8x32xf32, #tpu.memory_space<vmem>>) attributes {dimension_semantics = [#tpu.dimension_semantics<parallel>, #tpu.dimension_semantics<arbitrary>], iteration_bounds = array<i64: 1, 8>, scalar_prefetch = 0 : i64, scratch_operands = 2 : i64, tpu.core_type = #tpu.core_type<tc>, window_params = [{transform_indices = @transform_0, window_bounds = array<i64: 1, 8, 16>}, {pipeline_mode = #tpu.pipeline_mode<synchronous>, transform_indices = @transform_1, window_bounds = array<i64: 4, 16, 32>}, {pipeline_mode = #tpu.pipeline_mode<synchronous>, transform_indices = @transform_2, window_bounds = array<i64: 4, 1, 32>}, {pipeline_mode = #tpu.pipeline_mode<synchronous>, transform_indices = @transform_3, window_bounds = array<i64: 3, 32, 32>}, {pipeline_mode = #tpu.pipeline_mode<synchronous>, transform_indices = @transform_4, window_bounds = array<i64: 3, 1, 32>}, {pipeline_mode = #tpu.pipeline_mode<synchronous>, transform_indices = @transform_5, window_bounds = array<i64: 32, 32>}, {pipeline_mode = #tpu.pipeline_mode<synchronous>, transform_indices = @transform_6, window_bounds = array<i64: 1, 32>}, {pipeline_mode = #tpu.pipeline_mode<synchronous>, transform_indices = @transform_7, window_bounds = array<i64: 32, 4>}, {pipeline_mode = #tpu.pipeline_mode<synchronous>, transform_indices = @transform_8, window_bounds = array<i64: 1, 4>}, {transform_indices = @transform_9, window_bounds = array<i64: 8, 4>}]} {
    %c0_i32 = arith.constant 0 : i32
    %0 = arith.cmpi eq, %arg1, %c0_i32 : i32
    %1 = arith.extui %0 : i1 to i32
    %c0_i32_0 = arith.constant 0 : i32
    %2 = arith.cmpi ne, %1, %c0_i32_0 : i32
    scf.if %2 {
      %cst_68 = arith.constant 0.000000e+00 : f32
      %96 = vector.broadcast %cst_68 : f32 to vector<8x32xf32>
      %c0_69 = arith.constant 0 : index
      %c0_70 = arith.constant 0 : index
      %97 = vector.load %arg12[%c0_69, %c0_70] : memref<8x32xf32, #tpu.memory_space<vmem>>, vector<8x32xf32>
      tpu.vector_store %arg12[%c0_69, %c0_70], %96 {strides = array<i32>} : memref<8x32xf32, #tpu.memory_space<vmem>>, vector<8x32xf32>,
      %cst_71 = arith.constant 0.000000e+00 : f32
      %98 = vector.broadcast %cst_71 : f32 to vector<8x32xf32>
      %c0_72 = arith.constant 0 : index
      %c0_73 = arith.constant 0 : index
      %99 = vector.load %arg13[%c0_72, %c0_73] : memref<8x32xf32, #tpu.memory_space<vmem>>, vector<8x32xf32>
      tpu.vector_store %arg13[%c0_72, %c0_73], %98 {strides = array<i32>} : memref<8x32xf32, #tpu.memory_space<vmem>>, vector<8x32xf32>,
    } else {
    }
    %c0 = arith.constant 0 : index
    %c0_1 = arith.constant 0 : index
    %c0_2 = arith.constant 0 : index
    %3 = vector.load %arg2[%c0, %c0_1, %c0_2] : memref<1x8x16xf32, #tpu.memory_space<vmem>>, vector<1x8x16xf32>
    %4 = vector.shape_cast %3 : vector<1x8x16xf32> to vector<8x16xf32>
    %c0_3 = arith.constant 0 : index
    %c0_4 = arith.constant 0 : index
    %5 = vector.load %arg12[%c0_3, %c0_4] : memref<8x32xf32, #tpu.memory_space<vmem>>, vector<8x32xf32>
    %c0_5 = arith.constant 0 : index
    %c0_6 = arith.constant 0 : index
    %6 = vector.load %arg13[%c0_5, %c0_6] : memref<8x32xf32, #tpu.memory_space<vmem>>, vector<8x32xf32>
    %c0_7 = arith.constant 0 : index
    %c0_8 = arith.constant 0 : index
    %c0_9 = arith.constant 0 : index
    %7 = vector.load %arg3[%c0_7, %c0_8, %c0_9] : memref<4x16x32xf32, #tpu.memory_space<vmem>>, vector<1x16x32xf32>
    %8 = vector.shape_cast %7 : vector<1x16x32xf32> to vector<16x32xf32>
    %cst = arith.constant dense<0.000000e+00> : vector<8x32xf32>
    %9 = tpu.matmul %4, %8, %cst {dimension_numbers = #tpu.dot_dimension_numbers<[1], [0], [0], [1], [0, 0, 1, 1], [], []>} : vector<8x16xf32>, vector<16x32xf32>, vector<8x32xf32> -> vector<8x32xf32>
    %c0_10 = arith.constant 0 : index
    %c0_11 = arith.constant 0 : index
    %c0_12 = arith.constant 0 : index
    %10 = vector.load %arg4[%c0_10, %c0_11, %c0_12] : memref<4x1x32xf32, #tpu.memory_space<vmem>>, vector<1x1x32xf32>
    %11 = vector.shape_cast %10 : vector<1x1x32xf32> to vector<1x32xf32>
    %12 = vector.broadcast %11 : vector<1x32xf32> to vector<8x32xf32>
    %13 = arith.addf %9, %12 : vector<8x32xf32>
    %c1 = arith.constant 1 : index
    %c0_13 = arith.constant 0 : index
    %c0_14 = arith.constant 0 : index
    %14 = vector.load %arg3[%c1, %c0_13, %c0_14] : memref<4x16x32xf32, #tpu.memory_space<vmem>>, vector<1x16x32xf32>
    %15 = vector.shape_cast %14 : vector<1x16x32xf32> to vector<16x32xf32>
    %cst_15 = arith.constant dense<0.000000e+00> : vector<8x32xf32>
    %16 = tpu.matmul %4, %15, %cst_15 {dimension_numbers = #tpu.dot_dimension_numbers<[1], [0], [0], [1], [0, 0, 1, 1], [], []>} : vector<8x16xf32>, vector<16x32xf32>, vector<8x32xf32> -> vector<8x32xf32>
    %c1_16 = arith.constant 1 : index
    %c0_17 = arith.constant 0 : index
    %c0_18 = arith.constant 0 : index
    %17 = vector.load %arg4[%c1_16, %c0_17, %c0_18] : memref<4x1x32xf32, #tpu.memory_space<vmem>>, vector<1x1x32xf32>
    %18 = vector.shape_cast %17 : vector<1x1x32xf32> to vector<1x32xf32>
    %19 = vector.broadcast %18 : vector<1x32xf32> to vector<8x32xf32>
    %20 = arith.addf %16, %19 : vector<8x32xf32>
    %c2 = arith.constant 2 : index
    %c0_19 = arith.constant 0 : index
    %c0_20 = arith.constant 0 : index
    %21 = vector.load %arg3[%c2, %c0_19, %c0_20] : memref<4x16x32xf32, #tpu.memory_space<vmem>>, vector<1x16x32xf32>
    %22 = vector.shape_cast %21 : vector<1x16x32xf32> to vector<16x32xf32>
    %cst_21 = arith.constant dense<0.000000e+00> : vector<8x32xf32>
    %23 = tpu.matmul %4, %22, %cst_21 {dimension_numbers = #tpu.dot_dimension_numbers<[1], [0], [0], [1], [0, 0, 1, 1], [], []>} : vector<8x16xf32>, vector<16x32xf32>, vector<8x32xf32> -> vector<8x32xf32>
    %c2_22 = arith.constant 2 : index
    %c0_23 = arith.constant 0 : index
    %c0_24 = arith.constant 0 : index
    %24 = vector.load %arg4[%c2_22, %c0_23, %c0_24] : memref<4x1x32xf32, #tpu.memory_space<vmem>>, vector<1x1x32xf32>
    %25 = vector.shape_cast %24 : vector<1x1x32xf32> to vector<1x32xf32>
    %26 = vector.broadcast %25 : vector<1x32xf32> to vector<8x32xf32>
    %27 = arith.addf %23, %26 : vector<8x32xf32>
    %c3 = arith.constant 3 : index
    %c0_25 = arith.constant 0 : index
    %c0_26 = arith.constant 0 : index
    %28 = vector.load %arg3[%c3, %c0_25, %c0_26] : memref<4x16x32xf32, #tpu.memory_space<vmem>>, vector<1x16x32xf32>
    %29 = vector.shape_cast %28 : vector<1x16x32xf32> to vector<16x32xf32>
    %cst_27 = arith.constant dense<0.000000e+00> : vector<8x32xf32>
    %30 = tpu.matmul %4, %29, %cst_27 {dimension_numbers = #tpu.dot_dimension_numbers<[1], [0], [0], [1], [0, 0, 1, 1], [], []>} : vector<8x16xf32>, vector<16x32xf32>, vector<8x32xf32> -> vector<8x32xf32>
    %c3_28 = arith.constant 3 : index
    %c0_29 = arith.constant 0 : index
    %c0_30 = arith.constant 0 : index
    %31 = vector.load %arg4[%c3_28, %c0_29, %c0_30] : memref<4x1x32xf32, #tpu.memory_space<vmem>>, vector<1x1x32xf32>
    %32 = vector.shape_cast %31 : vector<1x1x32xf32> to vector<1x32xf32>
    %33 = vector.broadcast %32 : vector<1x32xf32> to vector<8x32xf32>
    %34 = arith.addf %30, %33 : vector<8x32xf32>
    %c0_31 = arith.constant 0 : index
    %c0_32 = arith.constant 0 : index
    %c0_33 = arith.constant 0 : index
    %35 = vector.load %arg5[%c0_31, %c0_32, %c0_33] : memref<3x32x32xf32, #tpu.memory_space<vmem>>, vector<1x32x32xf32>
    %36 = vector.shape_cast %35 : vector<1x32x32xf32> to vector<32x32xf32>
    %cst_34 = arith.constant dense<0.000000e+00> : vector<8x32xf32>
    %37 = tpu.matmul %5, %36, %cst_34 {dimension_numbers = #tpu.dot_dimension_numbers<[1], [0], [0], [1], [0, 0, 1, 1], [], []>} : vector<8x32xf32>, vector<32x32xf32>, vector<8x32xf32> -> vector<8x32xf32>
    %c0_35 = arith.constant 0 : index
    %c0_36 = arith.constant 0 : index
    %c0_37 = arith.constant 0 : index
    %38 = vector.load %arg6[%c0_35, %c0_36, %c0_37] : memref<3x1x32xf32, #tpu.memory_space<vmem>>, vector<1x1x32xf32>
    %39 = vector.shape_cast %38 : vector<1x1x32xf32> to vector<1x32xf32>
    %40 = vector.broadcast %39 : vector<1x32xf32> to vector<8x32xf32>
    %41 = arith.addf %37, %40 : vector<8x32xf32>
    %c1_38 = arith.constant 1 : index
    %c0_39 = arith.constant 0 : index
    %c0_40 = arith.constant 0 : index
    %42 = vector.load %arg5[%c1_38, %c0_39, %c0_40] : memref<3x32x32xf32, #tpu.memory_space<vmem>>, vector<1x32x32xf32>
    %43 = vector.shape_cast %42 : vector<1x32x32xf32> to vector<32x32xf32>
    %cst_41 = arith.constant dense<0.000000e+00> : vector<8x32xf32>
    %44 = tpu.matmul %5, %43, %cst_41 {dimension_numbers = #tpu.dot_dimension_numbers<[1], [0], [0], [1], [0, 0, 1, 1], [], []>} : vector<8x32xf32>, vector<32x32xf32>, vector<8x32xf32> -> vector<8x32xf32>
    %c1_42 = arith.constant 1 : index
    %c0_43 = arith.constant 0 : index
    %c0_44 = arith.constant 0 : index
    %45 = vector.load %arg6[%c1_42, %c0_43, %c0_44] : memref<3x1x32xf32, #tpu.memory_space<vmem>>, vector<1x1x32xf32>
    %46 = vector.shape_cast %45 : vector<1x1x32xf32> to vector<1x32xf32>
    %47 = vector.broadcast %46 : vector<1x32xf32> to vector<8x32xf32>
    %48 = arith.addf %44, %47 : vector<8x32xf32>
    %c2_45 = arith.constant 2 : index
    %c0_46 = arith.constant 0 : index
    %c0_47 = arith.constant 0 : index
    %49 = vector.load %arg5[%c2_45, %c0_46, %c0_47] : memref<3x32x32xf32, #tpu.memory_space<vmem>>, vector<1x32x32xf32>
    %50 = vector.shape_cast %49 : vector<1x32x32xf32> to vector<32x32xf32>
    %cst_48 = arith.constant dense<0.000000e+00> : vector<8x32xf32>
    %51 = tpu.matmul %5, %50, %cst_48 {dimension_numbers = #tpu.dot_dimension_numbers<[1], [0], [0], [1], [0, 0, 1, 1], [], []>} : vector<8x32xf32>, vector<32x32xf32>, vector<8x32xf32> -> vector<8x32xf32>
    %c2_49 = arith.constant 2 : index
    %c0_50 = arith.constant 0 : index
    %c0_51 = arith.constant 0 : index
    %52 = vector.load %arg6[%c2_49, %c0_50, %c0_51] : memref<3x1x32xf32, #tpu.memory_space<vmem>>, vector<1x1x32xf32>
    %53 = vector.shape_cast %52 : vector<1x1x32xf32> to vector<1x32xf32>
    %54 = vector.broadcast %53 : vector<1x32xf32> to vector<8x32xf32>
    %55 = arith.addf %51, %54 : vector<8x32xf32>
    %56 = arith.addf %13, %41 : vector<8x32xf32>
    %57 = arith.negf %56 : vector<8x32xf32>
    %58 = math.exp %57 : vector<8x32xf32>
    %cst_52 = arith.constant 1.000000e+00 : f32
    %59 = vector.broadcast %cst_52 : f32 to vector<8x32xf32>
    %60 = arith.addf %59, %58 : vector<8x32xf32>
    %61 = arith.divf %59, %60 : vector<8x32xf32>
    %cst_53 = arith.constant 5.000000e-01 : f32
    %62 = vector.broadcast %cst_53 : f32 to vector<8x32xf32>
    %63 = arith.mulf %62, %61 : vector<8x32xf32>
    %64 = arith.addf %20, %48 : vector<8x32xf32>
    %65 = arith.negf %64 : vector<8x32xf32>
    %66 = math.exp %65 : vector<8x32xf32>
    %cst_54 = arith.constant 1.000000e+00 : f32
    %67 = vector.broadcast %cst_54 : f32 to vector<8x32xf32>
    %68 = arith.addf %67, %66 : vector<8x32xf32>
    %69 = arith.divf %67, %68 : vector<8x32xf32>
    %cst_55 = arith.constant 5.000000e-01 : f32
    %70 = vector.broadcast %cst_55 : f32 to vector<8x32xf32>
    %71 = arith.mulf %70, %69 : vector<8x32xf32>
    %cst_56 = arith.constant 1.000000e+00 : f32
    %72 = vector.broadcast %cst_56 : f32 to vector<8x32xf32>
    %73 = arith.subf %72, %71 : vector<8x32xf32>
    %74 = arith.mulf %73, %6 : vector<8x32xf32>
    %75 = arith.addf %34, %55 : vector<8x32xf32>
    %76 = math.tanh %75 : vector<8x32xf32>
    %77 = arith.mulf %71, %76 : vector<8x32xf32>
    %78 = arith.addf %74, %77 : vector<8x32xf32>
    %c0_57 = arith.constant 0 : index
    %c0_58 = arith.constant 0 : index
    %79 = vector.load %arg7[%c0_57, %c0_58] : memref<32x32xf32, #tpu.memory_space<vmem>>, vector<32x32xf32>
    %cst_59 = arith.constant dense<0.000000e+00> : vector<8x32xf32>
    %80 = tpu.matmul %78, %79, %cst_59 {dimension_numbers = #tpu.dot_dimension_numbers<[1], [0], [0], [1], [0, 0, 1, 1], [], []>} : vector<8x32xf32>, vector<32x32xf32>, vector<8x32xf32> -> vector<8x32xf32>
    %c0_60 = arith.constant 0 : index
    %c0_61 = arith.constant 0 : index
    %81 = vector.load %arg8[%c0_60, %c0_61] : memref<1x32xf32, #tpu.memory_space<vmem>>, vector<1x32xf32>
    %82 = vector.broadcast %81 : vector<1x32xf32> to vector<8x32xf32>
    %83 = arith.addf %80, %82 : vector<8x32xf32>
    %cst_62 = arith.constant 1.000000e+00 : f32
    %84 = vector.broadcast %cst_62 : f32 to vector<8x32xf32>
    %85 = arith.subf %84, %63 : vector<8x32xf32>
    %86 = arith.mulf %85, %5 : vector<8x32xf32>
    %87 = arith.addf %83, %27 : vector<8x32xf32>
    %88 = math.tanh %87 : vector<8x32xf32>
    %89 = arith.mulf %63, %88 : vector<8x32xf32>
    %90 = arith.addf %86, %89 : vector<8x32xf32>
    %c0_63 = arith.constant 0 : index
    %c0_64 = arith.constant 0 : index
    %91 = vector.load %arg12[%c0_63, %c0_64] : memref<8x32xf32, #tpu.memory_space<vmem>>, vector<8x32xf32>
    tpu.vector_store %arg12[%c0_63, %c0_64], %90 {strides = array<i32>} : memref<8x32xf32, #tpu.memory_space<vmem>>, vector<8x32xf32>,
    %c0_65 = arith.constant 0 : index
    %c0_66 = arith.constant 0 : index
    %92 = vector.load %arg13[%c0_65, %c0_66] : memref<8x32xf32, #tpu.memory_space<vmem>>, vector<8x32xf32>
    tpu.vector_store %arg13[%c0_65, %c0_66], %78 {strides = array<i32>} : memref<8x32xf32, #tpu.memory_space<vmem>>, vector<8x32xf32>,
    %c7_i32 = arith.constant 7 : i32
    %93 = arith.cmpi eq, %arg1, %c7_i32 : i32
    %94 = arith.extui %93 : i1 to i32
    %c0_i32_67 = arith.constant 0 : i32
    %95 = arith.cmpi ne, %94, %c0_i32_67 : i32
    scf.if %95 {
      %c0_68 = arith.constant 0 : index
      %c0_69 = arith.constant 0 : index
      %96 = vector.load %arg9[%c0_68, %c0_69] : memref<32x4xf32, #tpu.memory_space<vmem>>, vector<32x4xf32>
      %cst_70 = arith.constant dense<0.000000e+00> : vector<8x4xf32>
      %97 = tpu.matmul %90, %96, %cst_70 {dimension_numbers = #tpu.dot_dimension_numbers<[1], [0], [0], [1], [0, 0, 1, 1], [], []>} : vector<8x32xf32>, vector<32x4xf32>, vector<8x4xf32> -> vector<8x4xf32>
      %c0_71 = arith.constant 0 : index
      %c0_72 = arith.constant 0 : index
      %98 = vector.load %arg10[%c0_71, %c0_72] : memref<1x4xf32, #tpu.memory_space<vmem>>, vector<1x4xf32>
      %99 = vector.broadcast %98 : vector<1x4xf32> to vector<8x4xf32>
      %100 = arith.addf %97, %99 : vector<8x4xf32>
      %c0_73 = arith.constant 0 : index
      %c0_74 = arith.constant 0 : index
      %101 = vector.load %arg11[%c0_73, %c0_74] : memref<8x4xf32, #tpu.memory_space<vmem>>, vector<8x4xf32>
      tpu.vector_store %arg11[%c0_73, %c0_74], %100 {strides = array<i32>} : memref<8x4xf32, #tpu.memory_space<vmem>>, vector<8x4xf32>,
    } else {
    }
    return
  }
  func.func @transform_0(%arg0: i32, %arg1: i32) -> (i32, i32, i32) {
    %c0_i32 = arith.constant 0 : i32
    %c0_i32_0 = arith.constant 0 : i32
    return %arg1, %arg0, %c0_i32 : i32, i32, i32
  }
  func.func @transform_1(%arg0: i32, %arg1: i32) -> (i32, i32, i32) {
    %c0_i32 = arith.constant 0 : i32
    %c0_i32_0 = arith.constant 0 : i32
    %c0_i32_1 = arith.constant 0 : i32
    %c0_i32_2 = arith.constant 0 : i32
    return %c0_i32, %c0_i32_0, %c0_i32_1 : i32, i32, i32
  }
  func.func @transform_2(%arg0: i32, %arg1: i32) -> (i32, i32, i32) {
    %c0_i32 = arith.constant 0 : i32
    %c0_i32_0 = arith.constant 0 : i32
    %c0_i32_1 = arith.constant 0 : i32
    %c0_i32_2 = arith.constant 0 : i32
    return %c0_i32, %c0_i32_0, %c0_i32_1 : i32, i32, i32
  }
  func.func @transform_3(%arg0: i32, %arg1: i32) -> (i32, i32, i32) {
    %c0_i32 = arith.constant 0 : i32
    %c0_i32_0 = arith.constant 0 : i32
    %c0_i32_1 = arith.constant 0 : i32
    %c0_i32_2 = arith.constant 0 : i32
    return %c0_i32, %c0_i32_0, %c0_i32_1 : i32, i32, i32
  }
  func.func @transform_4(%arg0: i32, %arg1: i32) -> (i32, i32, i32) {
    %c0_i32 = arith.constant 0 : i32
    %c0_i32_0 = arith.constant 0 : i32
    %c0_i32_1 = arith.constant 0 : i32
    %c0_i32_2 = arith.constant 0 : i32
    return %c0_i32, %c0_i32_0, %c0_i32_1 : i32, i32, i32
  }
  func.func @transform_5(%arg0: i32, %arg1: i32) -> (i32, i32) {
    %c0_i32 = arith.constant 0 : i32
    %c0_i32_0 = arith.constant 0 : i32
    %c0_i32_1 = arith.constant 0 : i32
    return %c0_i32, %c0_i32_0 : i32, i32
  }
  func.func @transform_6(%arg0: i32, %arg1: i32) -> (i32, i32) {
    %c0_i32 = arith.constant 0 : i32
    %c0_i32_0 = arith.constant 0 : i32
    %c0_i32_1 = arith.constant 0 : i32
    return %c0_i32, %c0_i32_0 : i32, i32
  }
  func.func @transform_7(%arg0: i32, %arg1: i32) -> (i32, i32) {
    %c0_i32 = arith.constant 0 : i32
    %c0_i32_0 = arith.constant 0 : i32
    %c0_i32_1 = arith.constant 0 : i32
    return %c0_i32, %c0_i32_0 : i32, i32
  }
  func.func @transform_8(%arg0: i32, %arg1: i32) -> (i32, i32) {
    %c0_i32 = arith.constant 0 : i32
    %c0_i32_0 = arith.constant 0 : i32
    %c0_i32_1 = arith.constant 0 : i32
    return %c0_i32, %c0_i32_0 : i32, i32
  }
  func.func @transform_9(%arg0: i32, %arg1: i32) -> (i32, i32) {
    %c0_i32 = arith.constant 0 : i32
    %c0_i32_0 = arith.constant 0 : i32
    return %arg0, %c0_i32 : i32, i32
  }
}

</mosaic_0001>

<bundles_post_ra>
// kernel: tpu_custom_call.1
= control target key start
LH: loop header
LB: loop body
LE: loop exit
PB: predicated region body
PF: predicated region fallthrough
CT: control target
= control target key end

     0   :  { %s1433_s0 = inlined_call_operand.hbm [shape: f32[8,8,16], index: 0, kind: input, shape index: {}]   ;;  %s1434_s1 = inlined_call_operand.hbm [shape: f32[4,16,32], index: 1, kind: input, shape index: {}]   ;;  %s1435_s2 = inlined_call_operand.vmem [shape: f32[4,1,32], index: 2, kind: input, shape index: {}]   ;;  %s1436_s3 = inlined_call_operand.hbm [shape: f32[3,32,32], index: 3, kind: input, shape index: {}]   ;;  %s1437_s4 = inlined_call_operand.hbm [shape: f32[3,1,32], index: 4, kind: input, shape index: {}]   ;;  %s1438_s5 = inlined_call_operand.vmem [shape: f32[32,32], index: 5, kind: input, shape index: {}]   ;;  %s1439_s6 = inlined_call_operand.vmem [shape: f32[1,32], index: 6, kind: input, shape index: {}]   ;;  %s1440_s7 = inlined_call_operand.vmem [shape: f32[32,4], index: 7, kind: input, shape index: {}]   ;;  %s1441_s8 = inlined_call_operand.vmem [shape: f32[1,4], index: 8, kind: input, shape index: {}]   ;;  %s1442_s9 = inlined_call_operand.vmem [shape: f32[8,4], index: 9, kind: output, shape index: {}]  }
   0x1   :  { %1444 = sst [smem:[#allocation15_spill]] %s1434_s1 }
   0x2   :  { %1445 = sst [smem:[#allocation16_spill]] %s1436_s3 }
   0x3   :  { %1446 = sst [smem:[#allocation17_spill]] %s1437_s4 }
   0x4   :  { %14 = vsyncpa [#allocation5], 0 }
   0x5   :  { %16 = vsyncpa [#allocation5 + $0x1], 0 }
   0x6   :  { %17 = vsyncpa [#allocation7], 0 }
   0x7   :  { %18 = vsyncpa [#allocation10], 0  ;;  %s1237_s30 = smov 0   ;;  %s1239_s10 = smov 0  }
   0x8   :  { %s1241_s11 = smov 0   ;;  %s1243_s12 = smov 0  }
   0x9   :  { %s1245_s13 = smov 0   ;;  %s1247_s14 = smov 0  }
   0xa LB: > { %s855_s15 = sadd.s32 4294967295, %s1177_s14   ;;  %p856_p0 = scmp.ge.s32.totalorder %s1177_s14, 1  ;;  %s1177_s14 = sphi %s1247_s14, %s24_s14   ;;  %s1173_s13 = sphi %s1245_s13, %s1461_s13   ;;  %s1169_s12 = sphi %s1243_s12, %s1460_s12   ;;  %s1165_s11 = sphi %s1241_s11, %s1459_s11   ;;  %s1161_s10 = sphi %s1239_s10, %s1458_s10   ;;  %s1157_s30 = sphi %s1237_s30, %s1457_s30  }
   0xb   : > { %p1269_p1 = scmp.eq.s32.totalorder %s855_s15, 0  ;;  %p263_p2 = scmp.lt.s32.totalorder %s1177_s14, 9 }
   0xc   : > { %s1448_s1 = sld [smem:[#allocation15_spill]]  ;;  %s1179_s21 = smov [#allocation6]  }
   0xd   : > { %p1277_p3 = pnand %p856_p0, %p263_p2  ;;  %s276_s22 = sshll.u32 %s1179_s21, 4  ;;  %s277_s22 = int_to_ptr.vmem [resolvable:$true] %s276_s22 }
   0xe   : > { %s1451_s3 = sld [smem:[#allocation16_spill]]  ;;  %s1180_s27 = smov 128  }
   0xf   : > { %p901_p4 = pneg %p1277_p3  ;;  %s1181_s28 = smov 8  }
  0x10   : > { %s1182_s29 = smov [#allocation8]   ;;  %s1452_s4 = sld [smem:[#allocation17_spill]] }
  0x11   : > { %p1285_p5 = pnand %p901_p4, %p1269_p1  ;;  %s293_s15 = sshll.u32 %s1182_s29, 4  ;;  %s294_s15 = int_to_ptr.vmem [resolvable:$true] %s293_s15 }
  0x12   : > { %s274_s19 = sshll.u32 %s1448_s1, 4  ;;  %s1183_s24 = smov [#allocation9]   ;;  %s275_s19 = int_to_ptr.hbm [resolvable:$true] %s274_s19 }
  0x13   : > { %904 = dma.hbm_to_vmem [thread:$0]  (!%p1285_p5), %s275_s19, 1024, %s277_s22, [#allocation7], %s1180_s27, %s1180_s27, %s1181_s28  }
  0x14   : > { %s291_s26 = sshll.u32 %s1451_s3, 4  ;;  %s307_s25 = sshll.u32 %s1183_s24, 4  ;;  %s292_s26 = int_to_ptr.hbm [resolvable:$true] %s291_s26  ;;  %s308_s25 = int_to_ptr.vmem [resolvable:$true] %s307_s25 }
  0x15   : > { %907 = dma.hbm_to_vmem [thread:$0]  (!%p1285_p5), %s292_s26, 1536, %s294_s15, [#allocation7], %s1180_s27, %s1180_s27, %s1181_s28  }
  0x16   : > { %s305_s21 = sshll.u32 %s1452_s4, 4  ;;  %s1184_s19 = smov 16   ;;  %s306_s21 = int_to_ptr.hbm [resolvable:$true] %s305_s21 }
  0x17   : > { %s1185_s22 = smov 1   ;;  %s33_s29 = sadd.s32 1, %s1173_s13 }
  0x18   : > { %910 = dma.hbm_to_vmem [thread:$0]  (!%p1285_p5), %s306_s21, 48, %s308_s25, [#allocation10], %s1184_s19, %s1184_s19, %s1185_s22  }
  0x19   : > { %p34_p6 = scmp.ge.s32.totalorder %s33_s29, 8  ;;  %p52_p7 = scmp.ne.s32.totalorder %s1165_s11, %s1161_s10 }
  0x1a   : > { %p53_p8 = scmp.eq.s32.totalorder %s1177_s14, 0  ;;  %s45_s26 = sadd.s32 1, %s1165_s11 }
  0x1b   : > { %s1463_s29 = smov (%p34_p6, %s33_s29), 0  ;;  %p58_p9 = scmp.ne.s32.totalorder %s1161_s10, %s1157_s30 }
  0x1c   : > { %1453 = sst [smem:[#allocation14_spill]] %s1463_s29  ;;  %s40_s27 = ssub.s32 %s1173_s13, %s1463_s29 }
  0x1d   : > { %p1312_p10 = por %p53_p8, %p52_p7  ;;  %p43_p11 = scmp.eq.s32.totalorder %s40_s27, 0 }
  0x1e   : > { %p1318_p12 = por %p1269_p1, %p58_p9  ;;  %s333_s15 = sand.u32 1, %s1165_s11  }
  0x1f   : > { %s862_s17 = sshll.u32 %s1173_s13, 3  ;;  %p918_p13 = scmp.lt.s32.totalorder %s1177_s14, 8 }
  0x20   : > { %s1325_s18 = scalar_select %p43_p11, %s1165_s11, %s45_s26  }
  0x21   : > { %s861_s21 = sshll.u32 %s333_s15, 3  ;;  %s342_s25 = scalar_lea.hbm %s1433_s0, %s862_s17 }
  0x22   : > { %s344_s19 = sshll.u32 %s342_s25, 4  ;;  %s337_s22 = scalar_lea.vmem [#allocation4], %s861_s21  ;;  %s345_s19 = int_to_ptr.hbm [resolvable:$true] %s344_s19 }
  0x23   : > { %s346_s1 = sshll.u32 %s337_s22, 4  ;;  %p912_p0 = pnand %p918_p13, %p1312_p10  ;;  %s347_s1 = int_to_ptr.vmem [resolvable:$true] %s346_s1 }
  0x24   : > { %s334_s27 = scalar_lea.sflag [#allocation5], %s333_s15  ;;  %355 = sbr.rel (%p1277_p3) target bundleno = 519 (0x207), region = 56 }
  0x25   : > { %914 = dma.hbm_to_vmem [thread:$0]  (!%p912_p0), %s345_s19, 128, %s347_s1, %s334_s27  }
  0x26   : > { %s357_s26 = sand.u32 (!%p1277_p3), 1, %s1161_s10  }
  0x27   : > { %s864_s3 = sshll.u32 (!%p1277_p3), %s357_s26, 3  ;;  %s358_s4 = scalar_lea.sflag (!%p1277_p3), [#allocation5], %s357_s26 }
  0x28   : > { %s361_s29 = scalar_lea.vmem (!%p1277_p3), [#allocation4], %s864_s3 }
  0x29   : > { %1144 = dma.done.wait (%p1318_p12), %s358_s4, 128  }
  0x2a   : > { %1146 = vsyncadd (%p1318_p12), %s358_s4, 4294967168 }
  0x2b   : > { %1148 = dma.done.wait (%p1269_p1), [#allocation7], 2560  }
  0x2c   : > { %1150 = vsyncadd (%p1269_p1), [#allocation7], 4294964736 }
  0x2d   : > { %1152 = dma.done.wait (%p1269_p1), [#allocation10], 48  }
  0x2e   : > { %1154 = vsyncadd (%p1269_p1), [#allocation10], 4294967248  ;;  %p868_p2 = scmp.ne.s32.totalorder %s1169_s12, 0 }
  0x30   : > { %418 = sbr.rel (%p868_p2) target bundleno = 56 (0x38), region = 76 }
  0x35   : > { %vm419_vm0 = vcmask 261120   ;;  %v1186_v0 = vmov 0.0  }
  0x36   : > { %420 = vst.msk [vmem:[#allocation2] sm:$0xff] %vm419_vm0, %v1186_v0 }
  0x37   : > { %421 = vst.msk [vmem:[#allocation3] sm:$0xff] %vm419_vm0, %v1186_v0 }
  0x38 PF: > { %v457_v1 = vld [vmem:[#allocation6 + $0x18] sm:$0xff]  ;;  %v456_v2 = vld [vmem:[#allocation6 + $0x10] sm:$0xff]  ;;  %vm431_vm1 = vcmask 130048   ;;  %v485_v5 = vld [vmem:[#allocation6 + $0x28] sm:$0xff]  ;;  %vm547_vm2 = vcmask 261120   ;;  %p882_p1 = scmp.ne.s32.totalorder %s1169_s12, 7 }
  0x39   : > { %477 = vmatpush.msra.mxu1 %v457_v1  ;;  %v422_v3 = vld [vmem:[%s361_s29] sm:$0xff]  ;;  %505 = vmatpush.msra.mxu2 %v485_v5  ;;  %v484_v7 = vld [vmem:[#allocation6 + $0x20] sm:$0xff]  ;;  %v573_v8 = vld [vmem:[#allocation8 + $0x28] sm:$0xff] }
  0x3a   : > { %v575_v4 = vld [vmem:[#allocation8 + $0x38] sm:$0xff]  ;;  %v574_v6 = vld [vmem:[#allocation8 + $0x30] sm:$0xff]  ;;  %v426_v13 = vld [vmem:[#allocation6 + $0x8] sm:$0xff] }
  0x3b   : > { %478 = vmatpush.msra.mxu1 %v456_v2  ;;  %v605_v9 = vld [vmem:[#allocation8 + $0x58] sm:$0xff]  ;;  %506 = vmatpush.msra.mxu2 %v484_v7  ;;  %v604_v11 = vld [vmem:[#allocation8 + $0x50] sm:$0xff]  ;;  %v572_v14 = vld [vmem:[#allocation8 + $0x20] sm:$0xff] }
  0x3c   : > { %871 = vmatmul.msk.f32.vlgmr.msra.gmra.mxu1 %vm431_vm1, %v422_v3  ;;  %v513_v10 = vld [vmem:[#allocation6 + $0x38] sm:$0xff]  ;;  %v512_v12 = vld [vmem:[#allocation6 + $0x30] sm:$0xff]  ;;  %873 = vmatmul.msk.f32.vlgmr.msra.gmra.mxu2 %vm431_vm1, %v422_v3  ;;  %v603_v15 = vld [vmem:[#allocation8 + $0x48] sm:$0xff] }
  0x3d   : > { %593 = vmatpush.msrb.mxu1 %v575_v4  ;;  %533 = vmatpush.msra.mxu3 %v513_v10  ;;  %v425_v16 = vld [vmem:[#allocation6] sm:$0xff]  ;;  %v542_v19 = vld [vmem:[#allocation8 + $0x18] sm:$0xff]  ;;  %v541_v20 = vld [vmem:[#allocation8 + $0x10] sm:$0xff] }
  0x3e   : > { %623 = vmatpush.msrb.mxu2 %v605_v9  ;;  %449 = vmatpush.msra.mxu0 %v426_v13  ;;  %v1351_v17 = vld [vmem:[#allocation2] sm:$0xff]  ;;  %v540_v21 = vld [vmem:[#allocation8 + $0x8] sm:$0xff]  ;;  %v682_v24 = vld [vmem:[%s1438_s5 + $0x18] sm:$0xff] }
  0x3f   : > { %594 = vmatpush.msrb.mxu1 %v574_v6  ;;  %534 = vmatpush.msra.mxu3 %v512_v12  ;;  %v602_v18 = vld [vmem:[#allocation8 + $0x40] sm:$0xff]  ;;  %v681_v25 = vld [vmem:[%s1438_s5 + $0x10] sm:$0xff]  ;;  %v680_v28 = vld [vmem:[%s1438_s5 + $0x8] sm:$0xff] }
  0x40   : > { %624 = vmatpush.msrb.mxu2 %v604_v11  ;;  %875 = vmatmul.msk.f32.vlgmr.msra.gmra.mxu3 %vm431_vm1, %v422_v3  ;;  %v539_v22 = vld [vmem:[#allocation8] sm:$0xff]  ;;  %v424_v57 = vld [vmem:[#allocation3] sm:$0xff] }
  0x41   : > { %595 = vmatpush.msrb.mxu1 %v573_v8  ;;  %450 = vmatpush.msra.mxu0 %v425_v16  ;;  %v978_v26 = vld [vmem:[%s1435_s2 + $0x1] ss:$0 sm:$0xff]  ;;  %v981_v38 = vld [vmem:[%s1435_s2 + $0x3] ss:$0 sm:$0xff]  ;;  %v982_v39 = vld [vmem:[#allocation9 + $0x2] ss:$0 sm:$0xff] }
  0x42   : > { %625 = vmatpush.msrb.mxu2 %v603_v15  ;;  %869 = vmatmul.msk.f32.vlgmr.msra.gmra.mxu0 %vm431_vm1, %v422_v3  ;;  %v979_v27 = vld [vmem:[#allocation9 + $0x1] ss:$0 sm:$0xff]  ;;  %v983_v63 = vld [vmem:[%s1435_s2] ss:$0 sm:$0xff]  ;;  %v980_v15 = vld [vmem:[%s1435_s2 + $0x2] ss:$0 sm:$0xff] }
  0x43   : > { %596 = vmatpush.msrb.mxu1 %v572_v14  ;;  %563 = vmatpush.msrb.mxu0 %v542_v19  ;;  %v679_v29 = vld [vmem:[%s1438_s5] sm:$0xff] }
  0x44   : > { %877 = vmatmul.msk.f32.vlgmr.msrb.gmra.mxu1 %vm547_vm2, %v1351_v17  ;;  %626 = vmatpush.msrb.mxu2 %v602_v18  ;;  %v984_v0 = vld [vmem:[#allocation9] ss:$0 sm:$0xff] }
  0x45   : > { %878 = vmatmul.msk.f32.vlgmr.msrb.gmra.mxu2 %vm547_vm2, %v1351_v17  ;;  %564 = vmatpush.msrb.mxu0 %v541_v20  ;;  %v985_v18 = vld [vmem:[%s1439_s6] ss:$0 sm:$0xff] }
  0x46   : > { %702 = vmatpush.msrb.mxu3 %v682_v24 }
  0x47   : > { %565 = vmatpush.msrb.mxu0 %v540_v21 }
  0x48   : > { %703 = vmatpush.msrb.mxu3 %v681_v25 }
  0x49   : > { %566 = vmatpush.msrb.mxu0 %v539_v22 }
  0x4a   : > { %876 = vmatmul.msk.f32.vlgmr.msrb.gmra.mxu0 %vm547_vm2, %v1351_v17  ;;  %704 = vmatpush.msrb.mxu3 %v680_v28 }
  0x4c   : > { %705 = vmatpush.msrb.mxu3 %v679_v29 }
  0xb9   : > { %v480_v23 = vpop.f32.mrf.mxu1 }
  0xba   : > { %v481_v31 = vadd.f32 %v978_v26, %v480_v23 }
  0xbf   : > { %v1376_v35 = vpop.f32.mrf.mxu2  ;;  %v452_v62 = vpop.f32.mrf.mxu0 }
  0xc0   : > { %v453_v2 = vadd.f32 %v983_v63, %v452_v62  ;;  %v509_v21 = vadd.f32 %v980_v15, %v1376_v35 }
  0xc1   : > { %v598_v30 = vpop.f32.mrf.mxu1 }
  0xc2   : > { %v599_v32 = vadd.f32 %v979_v27, %v598_v30 }
  0xc3   : > { %v536_v40 = vpop.f32.mrf.mxu3 }
  0xc4   : > { %v652_v33 = vadd.f32 %v599_v32, %v481_v31  ;;  %v537_v42 = vadd.f32 %v981_v38, %v536_v40 }
  0xc6   : > { %v880_v34 = vmul.f32 -1.442695, %v652_v33 }
  0xc7   : > { %v568_v1 = vpop.f32.mrf.mxu0 }
  0xc8   : > { %986 = vpow2.f32 %v880_v34  ;;  %v628_v41 = vpop.f32.mrf.mxu2  ;;  %v569_v3 = vadd.f32 %v984_v0, %v568_v1 }
  0xc9   : > { %v629_v43 = vadd.f32 %v982_v39, %v628_v41 }
  0xca   : > { %v631_v4 = vadd.f32 %v569_v3, %v453_v2 }
  0xcb   : > { %v675_v46 = vadd.f32 %v629_v43, %v537_v42 }
  0xcc   : > { %v879_v5 = vmul.f32 -1.442695, %v631_v4 }
  0xce   : > { %v987_v36 = vpop.eup %986 }
  0xcf   : > { %v656_v37 = vadd.f32 1.0, %v987_v36 }
  0xd1   : > { %988 = vrcp.f32 %v656_v37  ;;  %v668_v48 = vand.u32 2147483648, %v656_v37  ;;  %v666_v50 = vand.u32 2147483647, %v656_v37  ;;  %vm662_vm4 = vweird.f32 %v656_v37 }
  0xd2   : > { %990 = vtanh.f32 %v675_v46 }
  0xd3   : > { %v669_v52 = vor.u32 1.1754944e-38, %v668_v48  ;;  %vm667_vm6 = vcmp.eq.f32.partialorder %v666_v50, 8.507059e+37  ;;  %992 = vpow2.f32 %v879_v5 }
  0xd7   : > { %v989_v44 = vpop.eup %988 }
  0xd8   : > { %v658_v45 = vmul.f32 %v989_v44, %v656_v37  ;;  %vm663_vm3 = vweird.f32 %v989_v44  ;;  %v991_v56 = vpop.eup %990 }
  0xd9   : > { %vm664_vm5 = vmor %vm662_vm4, %vm663_vm3  ;;  %v993_v6 = vpop.eup %992 }
  0xda   : > { %v659_v47 = vsub.f32 1.0, %v658_v45  ;;  %v635_v7 = vadd.f32 1.0, %v993_v6 }
  0xdc   : > { %v660_v49 = vmul.f32 %v989_v44, %v659_v47  ;;  %994 = vrcp.f32 %v635_v7  ;;  %vm641_vm7 = vweird.f32 %v635_v7  ;;  %v647_v12 = vand.u32 2147483648, %v635_v7 }
  0xdd   : > { %v645_v14 = vand.u32 2147483647, %v635_v7 }
  0xde   : > { %v661_v51 = vadd.f32 %v989_v44, %v660_v49  ;;  %v648_v16 = vor.u32 1.1754944e-38, %v647_v12 }
  0xdf   : > { %vm646_vm10 = vcmp.eq.f32.partialorder %v645_v14, 8.507059e+37 }
  0xe0   : > { %v665_v53 = vsel %vm664_vm5, %v989_v44, %v661_v51 }
  0xe1   : > { %v670_v54 = vsel %vm667_vm6, %v669_v52, %v665_v53 }
  0xe2   : > { %v672_v55 = vmul.f32 0.5, %v670_v54  ;;  %v995_v8 = vpop.eup %994 }
  0xe3   : > { %v637_v9 = vmul.f32 %v995_v8, %v635_v7  ;;  %vm642_vm8 = vweird.f32 %v995_v8 }
  0xe4   : > { %v673_v58 = vsub.f32 1.0, %v672_v55  ;;  %v677_v60 = vmul.f32 %v991_v56, %v672_v55  ;;  %vm643_vm9 = vmor %vm641_vm7, %vm642_vm8 }
  0xe5   : > { %v638_v10 = vsub.f32 1.0, %v637_v9 }
  0xe6   : > { %v674_v59 = vmul.f32 %v673_v58, %v424_v57 }
  0xe7   : > { %v639_v11 = vmul.f32 %v995_v8, %v638_v10 }
  0xe8   : > { %v678_v61 = vadd.f32 %v677_v60, %v674_v59 }
  0xe9   : > { %v640_v13 = vadd.f32 %v995_v8, %v639_v11 }
  0xea   : > { %881 = vmatmul.msk.f32.vlgmr.msrb.gmra.mxu3 %vm547_vm2, %v678_v61  ;;  %717 = vst.msk [vmem:[#allocation3] sm:$0xff] %vm547_vm2, %v678_v61 }
  0xeb   : > { %v644_v19 = vsel %vm643_vm9, %v995_v8, %v640_v13 }
  0xec   : > { %v649_v22 = vsel %vm646_vm10, %v648_v16, %v644_v19 }
  0xed   : > { %v651_v25 = vmul.f32 0.5, %v649_v22 }
  0xef   : > { %v710_v26 = vsub.f32 1.0, %v651_v25 }
  0xf1   : > { %v711_v28 = vmul.f32 %v710_v26, %v1351_v17 }
 0x16d   : > { %v707_v20 = vpop.f32.mrf.mxu3 }
 0x16e   : > { %v708_v23 = vadd.f32 %v985_v18, %v707_v20 }
 0x170   : > { %v712_v24 = vadd.f32 %v708_v23, %v509_v21 }
 0x172   : > { %996 = vtanh.f32 %v712_v24 }
 0x178   : > { %v997_v27 = vpop.eup %996 }
 0x179   : > { %v714_v29 = vmul.f32 %v997_v27, %v651_v25  ;;  %721 = sbr.rel (%p882_p1) target bundleno = 519 (0x207), region = 80 }
 0x17b   : > { %v715_v30 = vadd.f32 %v714_v29, %v711_v28 }
 0x17d   : > { %716 = vst.msk [vmem:[#allocation2] sm:$0xff] %vm547_vm2, %v715_v30 }
 0x17e   : > { %v725_v31 = vld [vmem:[%s1440_s7 + $0x18] sm:$0xff]  ;;  %v724_v32 = vld [vmem:[%s1440_s7 + $0x10] sm:$0xff]  ;;  %v723_v17 = vld [vmem:[%s1440_s7 + $0x8] sm:$0xff]  ;;  %vm753_vm11 = vcmask 31744  }
 0x17f   : > { %745 = vmatpush.msra.mxu0 %v725_v31  ;;  %v722_v33 = vld [vmem:[%s1440_s7] sm:$0xff] }
 0x180   : > { %v998_v34 = vld [vmem:[%s1441_s8] ss:$0 sm:$0xff] }
 0x181   : > { %746 = vmatpush.msra.mxu0 %v724_v32 }
 0x183   : > { %747 = vmatpush.msra.mxu0 %v723_v17 }
 0x185   : > { %748 = vmatpush.msra.mxu0 %v722_v33 }
 0x186   : > { %883 = vmatmul.msk.f32.vlgmr.msra.gmra.mxu0 %vm547_vm2, %v715_v30 }
 0x203   : > { %v750_v35 = vpop.f32.mrf.mxu0 }
 0x204   : > { %v751_v36 = vadd.f32 %v998_v34, %v750_v35 }
 0x206   : > { %754 = vst.msk [vmem:[%s1442_s9] sm:$0xff] %vm753_vm11, %v751_v36 }
 0x207 PF: > { %s24_s14 = sadd.s32 1, %s1177_s14   ;;  %s1456_s24 = sld [smem:[#allocation14_spill]] }
 0x208   : > { %p21_p3 = scmp.ge.s32.totalorder %s24_s14, 10   ;;  %s1457_s30 = smov %s1161_s10 }
 0x209   : > { %s1458_s10 = smov %s1165_s11  ;;  %s1459_s11 = smov %s1325_s18 }
 0x20a   : > { %s1460_s12 = smov %s1173_s13  ;;  %23 = sbr.rel (!%p21_p3) target bundleno = 10 (0xa), region = 126 }
 0x20d   : > { %s1461_s13 = smov %s1456_s24 }
 0x20f   :  { %774 = vsyncpa [#allocation5], 1 }
 0x210   :  { %776 = vsyncpa [#allocation5 + $0x1], 1 }
 0x211   :  { %777 = vsyncpa [#allocation7], 1 }
 0x212   :  { %778 = vsyncpa [#allocation10], 1 }

</bundles_post_ra>
